<compile_context>
chip_gen: v7x
topology: tpu7x:2x2x1
jax: 0.10.0
libtpu: 0.0.40
codegen_flags: <defaults>
</compile_context>

<pallas_src>
import math
from typing import NamedTuple

import jax
import jax.numpy as jnp
from jax.experimental import pallas as pl
from jax.experimental.pallas import tpu as pltpu

_INV_SQRT2 = 1.0 / math.sqrt(2.0)
_MIB = 1024 * 1024


def _round_up(x, m):
    return ((x + m - 1) // m) * m


def _cdiv(a, b):
    return (a + b - 1) // b


def _vmem_capacity_bytes():
    """Physical VMEM of this TPU generation (fallback 64 MiB, v7x-safe)."""
    try:
        return int(pltpu.get_tpu_info().vmem_capacity_bytes)
    except Exception:
        return 64 * _MIB


def _gelu_exact_f32(h):
    # exact (erf) GELU in f32 -- matches torch.nn.GELU(approximate='none')
    return 0.5 * h * (1.0 + jax.lax.erf(h * _INV_SQRT2))


# --------------------------------------------------------------------------- #
# Kernels: one (row-tile i, fc2-output-tile j, c2-chunk k) step of
#     GELU(x @ W1^T + b1) @ W2^T + b2
# --------------------------------------------------------------------------- #
def _ffn_kernel_f32_out(x_ref, w1_ref, b1_ref, w2_ref, b2_ref, o_ref):
    """float32 output: accumulate directly into the resident output block."""
    k = pl.program_id(2)

    @pl.when(k == 0)
    def _():
        o_ref[...] = jnp.broadcast_to(b2_ref[...], o_ref.shape)

    h = jnp.dot(x_ref[...], w1_ref[...], preferred_element_type=jnp.float32)
    h = _gelu_exact_f32(h + b1_ref[...])
    o_ref[...] += jnp.dot(h.astype(w2_ref.dtype), w2_ref[...],
                          preferred_element_type=jnp.float32)


def _ffn_kernel_acc(x_ref, w1_ref, b1_ref, w2_ref, b2_ref, o_ref, acc_ref):
    """narrow output dtype: accumulate in an f32 VMEM scratch, cast at the end."""
    k = pl.program_id(2)

    @pl.when(k == 0)
    def _():
        acc_ref[...] = jnp.zeros_like(acc_ref)

    h = jnp.dot(x_ref[...], w1_ref[...], preferred_element_type=jnp.float32)
    h = _gelu_exact_f32(h + b1_ref[...])
    acc_ref[...] += jnp.dot(h.astype(w2_ref.dtype), w2_ref[...],
                            preferred_element_type=jnp.float32)

    @pl.when(k == pl.num_programs(2) - 1)
    def _():
        o_ref[...] = (acc_ref[...] + b2_ref[...]).astype(o_ref.dtype)


# --------------------------------------------------------------------------- #
# Parameter preparation (run ONCE per parameter set, outside the hot loop)
# --------------------------------------------------------------------------- #
class MLPFFNParams(NamedTuple):
    w1t: jax.Array   # [c1p, c2p]  fc1.weight^T, 128-padded, compute dtype
    b1: jax.Array    # [1, c2p]    f32
    w2t: jax.Array   # [c2p, c1p]  fc2.weight^T, 128-padded, compute dtype
    b2: jax.Array    # [1, c1p]    f32
    c1: int
    c2: int


def prepare_mlp_ffn_params(w1, b1, w2, b2, *, compute_dtype=jnp.bfloat16):
    """Transpose + cast + 128-pad PyTorch-layout Linear params once."""
    w1 = jnp.asarray(w1); b1 = jnp.asarray(b1)
    w2 = jnp.asarray(w2); b2 = jnp.asarray(b2)
    c2, c1 = w1.shape
    assert w2.shape == (c1, c2) and b1.shape == (c2,) and b2.shape == (c1,)
    c1p = _round_up(c1, 128)
    c2p = _round_up(c2, 128)
    w1t = jnp.pad(w1.T.astype(compute_dtype), ((0, c1p - c1), (0, c2p - c2)))
    w2t = jnp.pad(w2.T.astype(compute_dtype), ((0, c2p - c2), (0, c1p - c1)))
    b1r = jnp.pad(b1.astype(jnp.float32), (0, c2p - c2)).reshape(1, c2p)
    b2r = jnp.pad(b2.astype(jnp.float32), (0, c1p - c1)).reshape(1, c1p)
    return MLPFFNParams(w1t, b1r, w2t, b2r, int(c1), int(c2))


# --------------------------------------------------------------------------- #
# Main entry
# --------------------------------------------------------------------------- #
def mlp_ffn_prepared(x, params: MLPFFNParams, *, tm=256):
    orig_dtype = x.dtype
    w1t, b1r, w2t, b2r, c1, c2 = params
    c1p, c2p = w1t.shape
    assert x.shape[-1] == c1 and w2t.shape == (c2p, c1p)
    lead = x.shape[:-1]
    n = int(math.prod(lead)) if lead else 1

    compute_dtype = w1t.dtype
    c_item = jnp.dtype(compute_dtype).itemsize
    o_item = jnp.dtype(orig_dtype).itemsize
    f32_out = jnp.dtype(orig_dtype) == jnp.dtype(jnp.float32)

    # ---- generation-aware VMEM budgets --------------------------------------
    vmem = _vmem_capacity_bytes()
    vmem_ceiling = (vmem * 7) // 8                    # ~56 MiB v7x, ~112 MiB v5e/v6e
    weight_budget = vmem // 4 if vmem <= 80 * _MIB else vmem // 2
    fit_budget = (vmem_ceiling * 9) // 10             # headroom for compiler scratch

    # ---- hidden-dim (c2) chunk: prefer fully-resident weights ---------------
    col_bytes = 2 * c1p * c_item                      # one c2 column of W1^T + row of W2^T
    tc2_target = max(512, (weight_budget // max(col_bytes, 1)) // 128 * 128)
    tc2 = max(128, min(c2p, tc2_target))

    # ---- row tile (tm) and fc2-output tile (tn) sizing ----------------------
    tm = _round_up(max(16, min(int(tm), _round_up(n, 16))), 16)
    tn = c1p

    def vmem_estimate(tm_, tn_, tc2_, n_c2_, n_tn_):
        w1_bufs = 1 if n_c2_ == 1 else 2
        w2_bufs = 1 if (n_c2_ == 1 and n_tn_ == 1) else 2
        b2_bufs = 1 if n_tn_ == 1 else 2
        return (
            2 * tm_ * c1p * c_item                      # x tile (double-buffered)
            + 2 * tm_ * tn_ * o_item                    # out tile (double-buffered)
            + (0 if f32_out else tm_ * tn_ * 4)         # f32 accumulator scratch
            + w1_bufs * c1p * tc2_ * c_item             # W1^T chunk
            + w2_bufs * tc2_ * tn_ * c_item             # W2^T chunk
            + w1_bufs * tc2_ * 4 + b2_bufs * tn_ * 4    # biases
            + tm_ * tc2_ * 4                            # fc1/GELU f32 intermediate
        )

    for _ in range(24):
        n_c2, n_tn = _cdiv(c2p, tc2), _cdiv(c1p, tn)
        if vmem_estimate(tm, tn, tc2, n_c2, n_tn) <= fit_budget:
            break
        if tc2 > 512:                     # 1) shrink hidden chunk (no flop cost)
            tc2 = max(512, _round_up(tc2 // 2, 128))
            continue
        if tn > 1024:                     # 2) tile fc2 output dim (keeps tm large)
            tn = max(1024, _round_up(tn // 2, 128))
            continue
        if tm > 128:                      # 3) only then lower the row tile (floor 128)
            tm = max(128, _round_up(tm // 2, 16))
            continue
        if tn > 128:                      # 4) last resort: smaller output tile
            tn = max(128, _round_up(tn // 2, 128))
            continue
        break                             # give up; rely on vmem_limit ceiling

    # balance chunk sizes against the padded dims (minimizes extra padding)
    n_c2 = _cdiv(c2p, tc2)
    tc2 = _round_up(_cdiv(c2p, n_c2), 128)
    n_tn = _cdiv(c1p, tn)
    tn = _round_up(_cdiv(c1p, n_tn), 128)
    c2g = n_c2 * tc2                                   # grid coverage of hidden dim
    c1o = n_tn * tn                                    # grid coverage of fc2 output dim

    # give both v7x TensorCores a row tile when the batch allows it
    n_p = _round_up(n, tm)
    if n_p // tm < 2 and n >= 256 and n_tn == 1:
        tm = max(128, _round_up(_cdiv(n, 2), 16))
        n_p = _round_up(n, tm)
    grid_i = n_p // tm

    # ---- per-call operand padding (weights already 128-padded in prepare) ----
    x_p = jnp.pad(x.reshape(n, c1).astype(compute_dtype),
                  ((0, n_p - n), (0, c1p - c1)))
    w1_p = w1t if c2g == c2p else jnp.pad(w1t, ((0, 0), (0, c2g - c2p)))
    b1_p = b1r if c2g == c2p else jnp.pad(b1r, ((0, 0), (0, c2g - c2p)))
    w2_p = w2t
    if c2g != c2p or c1o != c1p:
        w2_p = jnp.pad(w2t, ((0, c2g - c2p), (0, c1o - c1p)))
    b2_p = b2r if c1o == c1p else jnp.pad(b2r, ((0, 0), (0, c1o - c1p)))

    # blocks whose index is constant across the whole grid only need one buffer
    def _spec(shape, index_map, single):
        if single:
            return pl.BlockSpec(shape, index_map, pipeline_mode=pl.Buffered(1))
        return pl.BlockSpec(shape, index_map)

    w1_resident = n_c2 == 1
    w2_resident = n_c2 == 1 and n_tn == 1
    b2_resident = n_tn == 1

    in_specs = [
        pl.BlockSpec((tm, c1p), lambda i, j, k: (i, 0)),                     # x rows
        _spec((c1p, tc2), lambda i, j, k: (0, k), w1_resident),              # W1^T chunk
        _spec((1, tc2), lambda i, j, k: (0, k), w1_resident),                # b1 chunk
        _spec((tc2, tn), lambda i, j, k: (k, j), w2_resident),               # W2^T chunk
        _spec((1, tn), lambda i, j, k: (0, j), b2_resident),                 # b2 tile
    ]
    out_spec = pl.BlockSpec((tm, tn), lambda i, j, k: (i, j))

    if f32_out:
        kernel = _ffn_kernel_f32_out
        scratch_shapes = []
    else:
        kernel = _ffn_kernel_acc
        scratch_shapes = [pltpu.VMEM((tm, tn), jnp.float32)]

    vmem_est = vmem_estimate(tm, tn, tc2, n_c2, n_tn)
    vmem_limit = int(min(max(int(vmem_est * 1.15) + 2 * _MIB, 32 * _MIB), vmem_ceiling))

    # weight traffic multipliers for the non-resident case (true HBM cost)
    w1_reads = 1 if w1_resident else grid_i * n_tn
    w2_reads = 1 if w2_resident else (grid_i if n_c2 == 1 else grid_i * n_tn)
    cost = pl.CostEstimate(
        flops=int(2 * n * c1 * c2 * (1 + n_tn)),       # fc2 + fc1 (recomputed per out-tile)
        transcendentals=int(n * c2 * n_tn),            # erf per hidden activation
        bytes_accessed=int(
            x_p.size * c_item + n_p * c1o * o_item
            + w1_p.size * c_item * w1_reads + w2_p.size * c_item * w2_reads
            + b1_p.size * 4 * w1_reads + b2_p.size * 4
        ),
    )

    out_p = pl.pallas_call(
        kernel,
        out_shape=jax.ShapeDtypeStruct((n_p, c1o), orig_dtype),
        grid_spec=pltpu.PrefetchScalarGridSpec(
            num_scalar_prefetch=0,
            grid=(grid_i, n_tn, n_c2),
            in_specs=in_specs,
            out_specs=out_spec,
            scratch_shapes=scratch_shapes,
        ),
        compiler_params=pltpu.CompilerParams(
            dimension_semantics=("parallel", "parallel", "arbitrary"),
            vmem_limit_bytes=vmem_limit,
        ),
        cost_estimate=cost,
    )(x_p, w1_p, b1_p, w2_p, b2_p)

    return out_p[:n, :c1].reshape(*lead, c1)


def mlp_ffn(x, w1, b1, w2, b2, *, tm=256, compute_dtype=jnp.bfloat16):
    """PyTorch layout: w1: [c2, c1]; b1: [c2]; w2: [c1, c2]; b2: [c1].

    For repeated calls with fixed params, call prepare_mlp_ffn_params() once and
    use mlp_ffn_prepared() directly (avoids re-transposing/casting/padding weights).
    """
    params = prepare_mlp_ffn_params(w1, b1, w2, b2, compute_dtype=compute_dtype)
    return mlp_ffn_prepared(x, params, tm=tm)


# --------------------------------------------------------------------------- #
# Init + reference + self-test
# --------------------------------------------------------------------------- #
def init_mlp_ffn_params(key, c1, c2, dtype=jnp.float32):
    """Deterministic init mirroring nn.Linear defaults (uniform +/- 1/sqrt(fan_in))."""
    k1, k2, k3, k4 = jax.random.split(key, 4)
    bound1 = 1.0 / math.sqrt(c1)
    bound2 = 1.0 / math.sqrt(c2)
    w1 = jax.random.uniform(k1, (c2, c1), dtype, -bound1, bound1)  # fc1.weight
    b1 = jax.random.uniform(k2, (c2,), dtype, -bound1, bound1)     # fc1.bias
    w2 = jax.random.uniform(k3, (c1, c2), dtype, -bound2, bound2)  # fc2.weight
    b2 = jax.random.uniform(k4, (c1,), dtype, -bound2, bound2)     # fc2.bias
    return w1, b1, w2, b2


def _reference(x, w1, b1, w2, b2):
    h = x @ w1.T + b1
    h = 0.5 * h * (1.0 + jax.lax.erf(h / math.sqrt(2.0)))
    return h @ w2.T + b2


if __name__ == "__main__":
    key = jax.random.PRNGKey(0)
    kx, kp, kx2, kp2 = jax.random.split(key, 4)

    # 1) Small shapes the module implies (f32 output -> accumulate-into-output kernel).
    batch, seq, c1, c2 = 2, 8, 32, 64
    x = jax.random.normal(kx, (batch, seq, c1), jnp.float32)
    w1, b1, w2, b2 = init_mlp_ffn_params(kp, c1, c2)
    out = jax.block_until_ready(mlp_ffn(x, w1, b1, w2, b2))
    ref = _reference(x, w1, b1, w2, b2)
    assert out.shape == x.shape and out.dtype == x.dtype
    # bf16 matmul operands with f32 accumulation -> small drift vs f32 reference
    assert jnp.allclose(out, ref, atol=5e-2, rtol=5e-2), "mismatch vs reference (small)"

    # 2) Multiple row tiles + 128-aligned dims (f32 output path).
    bb, ss, cc1, cc2 = 4, 96, 128, 256
    x2 = jax.random.normal(kx2, (bb, ss, cc1), jnp.float32)
    p2 = init_mlp_ffn_params(kp2, cc1, cc2)
    out2 = jax.block_until_ready(mlp_ffn(x2, *p2))
    ref2 = _reference(x2, *p2)
    assert out2.shape == x2.shape
    assert jnp.allclose(out2, ref2, atol=5e-2, rtol=5e-2), "mismatch vs reference (tiled)"

    # 3) bf16 activations -> exercises the f32-scratch accumulator kernel + prepared path.
    params3 = prepare_mlp_ffn_params(*p2)
    out3 = jax.block_until_ready(mlp_ffn_prepared(x2.astype(jnp.bfloat16), params3))
    assert out3.shape == x2.shape and out3.dtype == jnp.bfloat16
    assert jnp.allclose(out3.astype(jnp.float32), ref2, atol=1e-1, rtol=1e-1), \
        "mismatch vs reference (bf16)"

    print("KERNEL_OK")
</pallas_src>

<mosaic_0001>
module attributes {stable_mosaic.version = 11 : i64} {
  func.func @_ffn_kernel_f32_out(%arg0: i32, %arg1: i32, %arg2: i32, %arg3: memref<16x128xbf16, #tpu.memory_space<vmem>>, %arg4: memref<128x128xbf16, #tpu.memory_space<vmem>>, %arg5: memref<1x128xf32, #tpu.memory_space<vmem>>, %arg6: memref<128x128xbf16, #tpu.memory_space<vmem>>, %arg7: memref<1x128xf32, #tpu.memory_space<vmem>>, %arg8: memref<16x128xf32, #tpu.memory_space<vmem>>) attributes {dimension_semantics = [#tpu.dimension_semantics<parallel>, #tpu.dimension_semantics<parallel>, #tpu.dimension_semantics<arbitrary>], iteration_bounds = array<i64: 1, 1, 1>, scalar_prefetch = 0 : i64, scratch_operands = 0 : i64, tpu.core_type = #tpu.core_type<tc>, window_params = [{transform_indices = @transform_0, window_bounds = array<i64: 16, 128>}, {pipeline_mode = #tpu.pipeline_mode<synchronous>, transform_indices = @transform_1, window_bounds = array<i64: 128, 128>}, {pipeline_mode = #tpu.pipeline_mode<synchronous>, transform_indices = @transform_2, window_bounds = array<i64: 1, 128>}, {pipeline_mode = #tpu.pipeline_mode<synchronous>, transform_indices = @transform_3, window_bounds = array<i64: 128, 128>}, {pipeline_mode = #tpu.pipeline_mode<synchronous>, transform_indices = @transform_4, window_bounds = array<i64: 1, 128>}, {transform_indices = @transform_5, window_bounds = array<i64: 16, 128>}]} {
    %c0_i32 = arith.constant 0 : i32
    %0 = arith.cmpi eq, %arg2, %c0_i32 : i32
    %1 = arith.extui %0 : i1 to i32
    %c0_i32_0 = arith.constant 0 : i32
    %2 = arith.cmpi ne, %1, %c0_i32_0 : i32
    scf.if %2 {
      %c0_16 = arith.constant 0 : index
      %c0_17 = arith.constant 0 : index
      %23 = vector.load %arg7[%c0_16, %c0_17] : memref<1x128xf32, #tpu.memory_space<vmem>>, vector<1x128xf32>
      %24 = vector.shape_cast %23 : vector<1x128xf32> to vector<1x128xf32>
      %25 = vector.broadcast %24 : vector<1x128xf32> to vector<16x128xf32>
      %c0_18 = arith.constant 0 : index
      %c0_19 = arith.constant 0 : index
      %26 = vector.load %arg8[%c0_18, %c0_19] : memref<16x128xf32, #tpu.memory_space<vmem>>, vector<16x128xf32>
      tpu.vector_store %arg8[%c0_18, %c0_19], %25 {strides = array<i32>} : memref<16x128xf32, #tpu.memory_space<vmem>>, vector<16x128xf32>,
    } else {
    }
    %c0 = arith.constant 0 : index
    %c0_1 = arith.constant 0 : index
    %3 = vector.load %arg3[%c0, %c0_1] : memref<16x128xbf16, #tpu.memory_space<vmem>>, vector<16x128xbf16>
    %c0_2 = arith.constant 0 : index
    %c0_3 = arith.constant 0 : index
    %4 = vector.load %arg4[%c0_2, %c0_3] : memref<128x128xbf16, #tpu.memory_space<vmem>>, vector<128x128xbf16>
    %cst = arith.constant dense<0.000000e+00> : vector<16x128xf32>
    %5 = tpu.matmul %3, %4, %cst {dimension_numbers = #tpu.dot_dimension_numbers<[1], [0], [0], [1], [0, 0, 1, 1], [], []>} : vector<16x128xbf16>, vector<128x128xbf16>, vector<16x128xf32> -> vector<16x128xf32>
    %c0_4 = arith.constant 0 : index
    %c0_5 = arith.constant 0 : index
    %6 = vector.load %arg5[%c0_4, %c0_5] : memref<1x128xf32, #tpu.memory_space<vmem>>, vector<1x128xf32>
    %7 = vector.broadcast %6 : vector<1x128xf32> to vector<16x128xf32>
    %8 = arith.addf %5, %7 : vector<16x128xf32>
    %cst_6 = arith.constant 5.000000e-01 : f32
    %9 = vector.broadcast %cst_6 : f32 to vector<16x128xf32>
    %10 = arith.mulf %9, %8 : vector<16x128xf32>
    %cst_7 = arith.constant 0.707106769 : f32
    %11 = vector.broadcast %cst_7 : f32 to vector<16x128xf32>
    %12 = arith.mulf %8, %11 : vector<16x128xf32>
    %13 = math.erf %12 : vector<16x128xf32>
    %cst_8 = arith.constant 1.000000e+00 : f32
    %14 = vector.broadcast %cst_8 : f32 to vector<16x128xf32>
    %15 = arith.addf %14, %13 : vector<16x128xf32>
    %16 = arith.mulf %10, %15 : vector<16x128xf32>
    %c0_9 = arith.constant 0 : index
    %c0_10 = arith.constant 0 : index
    %17 = vector.load %arg8[%c0_9, %c0_10] : memref<16x128xf32, #tpu.memory_space<vmem>>, vector<16x128xf32>
    %18 = arith.truncf %16 : vector<16x128xf32> to vector<16x128xbf16>
    %c0_11 = arith.constant 0 : index
    %c0_12 = arith.constant 0 : index
    %19 = vector.load %arg6[%c0_11, %c0_12] : memref<128x128xbf16, #tpu.memory_space<vmem>>, vector<128x128xbf16>
    %cst_13 = arith.constant dense<0.000000e+00> : vector<16x128xf32>
    %20 = tpu.matmul %18, %19, %cst_13 {dimension_numbers = #tpu.dot_dimension_numbers<[1], [0], [0], [1], [0, 0, 1, 1], [], []>} : vector<16x128xbf16>, vector<128x128xbf16>, vector<16x128xf32> -> vector<16x128xf32>
    %21 = arith.addf %17, %20 : vector<16x128xf32>
    %c0_14 = arith.constant 0 : index
    %c0_15 = arith.constant 0 : index
    %22 = vector.load %arg8[%c0_14, %c0_15] : memref<16x128xf32, #tpu.memory_space<vmem>>, vector<16x128xf32>
    tpu.vector_store %arg8[%c0_14, %c0_15], %21 {strides = array<i32>} : memref<16x128xf32, #tpu.memory_space<vmem>>, vector<16x128xf32>,
    return
  }
  func.func @transform_0(%arg0: i32, %arg1: i32, %arg2: i32) -> (i32, i32) {
    %c0_i32 = arith.constant 0 : i32
    %c0_i32_0 = arith.constant 0 : i32
    return %arg0, %c0_i32 : i32, i32
  }
  func.func @transform_1(%arg0: i32, %arg1: i32, %arg2: i32) -> (i32, i32) {
    %c0_i32 = arith.constant 0 : i32
    %c0_i32_0 = arith.constant 0 : i32
    return %c0_i32, %arg2 : i32, i32
  }
  func.func @transform_2(%arg0: i32, %arg1: i32, %arg2: i32) -> (i32, i32) {
    %c0_i32 = arith.constant 0 : i32
    %c0_i32_0 = arith.constant 0 : i32
    return %c0_i32, %arg2 : i32, i32
  }
  func.func @transform_3(%arg0: i32, %arg1: i32, %arg2: i32) -> (i32, i32) {
    %c0_i32 = arith.constant 0 : i32
    return %arg2, %arg1 : i32, i32
  }
  func.func @transform_4(%arg0: i32, %arg1: i32, %arg2: i32) -> (i32, i32) {
    %c0_i32 = arith.constant 0 : i32
    %c0_i32_0 = arith.constant 0 : i32
    return %c0_i32, %arg1 : i32, i32
  }
  func.func @transform_5(%arg0: i32, %arg1: i32, %arg2: i32) -> (i32, i32) {
    %c0_i32 = arith.constant 0 : i32
    return %arg0, %arg1 : i32, i32
  }
}

</mosaic_0001>

<bundles_post_ra>
// kernel: tpu_custom_call.1
= control target key start
LH: loop header
LB: loop body
LE: loop exit
PB: predicated region body
PF: predicated region fallthrough
CT: control target
= control target key end

     0   :  { %10 = vsyncpa [#allocation3], 0  ;;  %s648_s0 = inlined_call_operand.hbm [shape: bf16[16,128], index: 0, kind: input, shape index: {}]   ;;  %s649_s1 = inlined_call_operand.hbm [shape: bf16[128,128], index: 1, kind: input, shape index: {}]   ;;  %s650_s2 = inlined_call_operand.vmem [shape: f32[1,128], index: 2, kind: input, shape index: {}]   ;;  %s651_s3 = inlined_call_operand.hbm [shape: bf16[128,128], index: 3, kind: input, shape index: {}]   ;;  %s652_s4 = inlined_call_operand.vmem [shape: f32[1,128], index: 4, kind: input, shape index: {}]   ;;  %s653_s5 = inlined_call_operand.hbm [shape: f32[16,128], index: 5, kind: output, shape index: {}]  }
   0x1   :  { %11 = vsyncpa [#allocation6], 0 }
   0x2   :  { %12 = vsyncpa [#allocation4], 0  ;;  %s538_s18 = smov [#allocation5]   ;;  %s539_s20 = smov [#allocation2]  }
   0x3   :  { %s30_s19 = sshll.u32 %s538_s18, 4  ;;  %s18_s21 = sshll.u32 %s539_s20, 4  ;;  %s31_s19 = int_to_ptr.vmem [resolvable:$true] %s30_s19  ;;  %s578_s21 = int_to_ptr.vmem [resolvable:$true] %s18_s21 }
   0x4   :  { %s444_s24 = scalar_lea.hbm %s649_s1, 1024 }
   0x5   :  { %p445_p0 = scmp.ne.s32.totalorder %s649_s1, %s444_s24  ;;  %p448_p1 = scmp.lt.u32.totalorder %s444_s24, %s649_s1 }
   0x7   :  { %p450_p2 = pnand %p448_p1, %p445_p0 }
   0x9   :  { %453 = shalt.err (!%p450_p2)
}
   0xa   :  { %s454_s29 = scalar_lea.vmem %s31_s19, 1024  ;;  %p459_p4 = scmp.lt.s32.totalorder %s31_s19, %s31_s19 }
   0xb   :  { %p455_p3 = scmp.ne.s32.totalorder %s31_s19, %s454_s29  ;;  %p460_p5 = scmp.lt.s32.totalorder %s454_s29, %s454_s29 }
   0xd   :  { %p461_p6 = por %p460_p5, %p459_p4 }
   0xf   :  { %p462_p7 = pnand %p461_p6, %p455_p3 }
  0x11   :  { %465 = shalt.err (!%p462_p7)
}
  0x12   :  { %s540_s30 = smov 64   ;;  %s541_s6 = smov 4  }
  0x13   :  { %36 = dma.hbm_to_vmem [thread:$0]  %s649_s1, 1024, %s31_s19, [#allocation6], %s540_s30, %s540_s30, %s541_s6  }
  0x14   :  { %s466_s11 = scalar_lea.hbm %s648_s0, 128 }
  0x15   :  { %p467_p8 = scmp.ne.s32.totalorder %s648_s0, %s466_s11  ;;  %p470_p9 = scmp.lt.u32.totalorder %s466_s11, %s648_s0 }
  0x17   :  { %p472_p10 = pnand %p470_p9, %p467_p8 }
  0x19   :  { %475 = shalt.err (!%p472_p10)
}
  0x1a   :  { %s476_s16 = scalar_lea.vmem %s578_s21, 128  ;;  %p481_p12 = scmp.lt.s32.totalorder %s578_s21, %s578_s21 }
  0x1b   :  { %p477_p11 = scmp.ne.s32.totalorder %s578_s21, %s476_s16  ;;  %p482_p13 = scmp.lt.s32.totalorder %s476_s16, %s476_s16 }
  0x1d   :  { %p483_p0 = por %p482_p13, %p481_p12 }
  0x1f   :  { %p484_p1 = pnand %p483_p0, %p477_p11 }
  0x21   :  { %487 = shalt.err (!%p484_p1)
}
  0x22   :  { %24 = dma.hbm_to_vmem [thread:$0]  %s648_s0, 128, %s578_s21, [#allocation3], %s540_s30, %s540_s30, %s541_s6  }
  0x23   :  { %s542_s18 = smov [#allocation7]   ;;  %s488_s23 = scalar_lea.hbm %s651_s3, 1024 }
  0x24   :  { %s44_s19 = sshll.u32 %s542_s18, 4  ;;  %p489_p2 = scmp.ne.s32.totalorder %s651_s3, %s488_s23  ;;  %s45_s19 = int_to_ptr.vmem [resolvable:$true] %s44_s19 }
  0x25   :  { %p492_p3 = scmp.lt.u32.totalorder %s488_s23, %s651_s3 }
  0x27   :  { %p494_p4 = pnand %p492_p3, %p489_p2 }
  0x29   :  { %497 = shalt.err (!%p494_p4)
}
  0x2a   :  { %s498_s28 = scalar_lea.vmem %s45_s19, 1024  ;;  %p503_p6 = scmp.lt.s32.totalorder %s45_s19, %s45_s19 }
  0x2b   :  { %p499_p5 = scmp.ne.s32.totalorder %s45_s19, %s498_s28  ;;  %p504_p7 = scmp.lt.s32.totalorder %s498_s28, %s498_s28 }
  0x2d   :  { %p505_p8 = por %p504_p7, %p503_p6 }
  0x2f   :  { %p506_p9 = pnand %p505_p8, %p499_p5 }
  0x31   :  { %509 = shalt.err (!%p506_p9)
}
  0x32   :  { %50 = dma.hbm_to_vmem [thread:$0]  %s651_s3, 1024, %s45_s19, [#allocation6], %s540_s30, %s540_s30, %s541_s6  }
  0x33   :  { %532 = dma.done.wait [#allocation3], 128  }
  0x34   :  { %533 = vsyncadd [#allocation3], 4294967168 }
  0x35   :  { %534 = dma.done.wait [#allocation6], 2048  }
  0x36   :  { %535 = vsyncadd [#allocation6], 4294965248  ;;  %v543_v0 = vmov 0.0   ;;  %vm544_vm0 = vmmov 0   ;;  %v423_v1 = vld [vmem:[#allocation5] sm:$0xff]   ;;  %v424_v2 = vld [vmem:[#allocation5 + $0x8] sm:$0xff]  }
  0x37   :  { %373 = vmatprep.subr.bf16.mxu0 %v543_v0  ;;  %389 = vmatprep.mubr.msk.bf16.mxu0 %vm544_vm0, %v543_v0  ;;  %v425_v3 = vld [vmem:[#allocation5 + $0x10] sm:$0xff]   ;;  %v432_v4 = vld [vmem:[#allocation7] sm:$0xff]   ;;  %v426_v5 = vld [vmem:[#allocation5 + $0x18] sm:$0xff]   ;;  %s545_s6 = smov [#allocation8]  }
  0x38   :  { %393 = vmatprep.subr.bf16.mxu1 %v543_v0  ;;  %409 = vmatprep.mubr.msk.bf16.mxu1 %vm544_vm0, %v543_v0  ;;  %v433_v6 = vld [vmem:[#allocation7 + $0x8] sm:$0xff]   ;;  %v427_v7 = vld [vmem:[#allocation5 + $0x20] sm:$0xff]   ;;  %v429_v9 = vld [vmem:[#allocation5 + $0x30] sm:$0xff]   ;;  %s323_s7 = sshll.u32 %s545_s6, 4  ;;  %s324_s7 = int_to_ptr.vmem [resolvable:$true] %s323_s7 }
  0x39   :  { %374 = vmatpush3.bf16.msra.mxu0 %v423_v1  ;;  %394 = vmatpush3.bf16.msra.mxu1 %v432_v4  ;;  %v428_v8 = vld [vmem:[#allocation5 + $0x28] sm:$0xff]   ;;  %v430_v10 = vld [vmem:[#allocation5 + $0x38] sm:$0xff]   ;;  %v434_v12 = vld [vmem:[#allocation7 + $0x10] sm:$0xff]   ;;  %s510_s8 = scalar_lea.vmem %s324_s7, 256  ;;  %p515_p11 = scmp.lt.s32.totalorder %s324_s7, %s324_s7 }
  0x3a   :  { %375 = vmatprep.subr.bf16.mxu0 %v543_v0  ;;  %395 = vmatprep.subr.bf16.mxu1 %v543_v0  ;;  %v431_v11 = vld [vmem:[#allocation2] sm:$0xff]   ;;  %v436_v14 = vld [vmem:[#allocation7 + $0x20] sm:$0xff]   ;;  %v437_v15 = vld [vmem:[#allocation7 + $0x28] sm:$0xff]   ;;  %p511_p10 = scmp.ne.s32.totalorder %s324_s7, %s510_s8  ;;  %p516_p12 = scmp.lt.s32.totalorder %s510_s8, %s510_s8 }
  0x3b   :  { %v435_v13 = vld [vmem:[#allocation7 + $0x18] sm:$0xff]   ;;  %v438_v16 = vld [vmem:[#allocation7 + $0x30] sm:$0xff]  }
  0x3c   :  { %v439_v17 = vld [vmem:[#allocation7 + $0x38] sm:$0xff]   ;;  %p517_p13 = por %p516_p12, %p515_p11 }
  0x3d   :  { %376 = vmatpush3.bf16.msra.mxu0 %v424_v2  ;;  %396 = vmatpush3.bf16.msra.mxu1 %v433_v6  ;;  %v337_v18 = vld [vmem:[%s650_s2] ss:$0 sm:$0xff] }
  0x3e   :  { %377 = vmatprep.subr.bf16.mxu0 %v543_v0  ;;  %397 = vmatprep.subr.bf16.mxu1 %v543_v0  ;;  %v336_v36 = vld [vmem:[%s652_s4] ss:$0 sm:$0xff]  ;;  %p518_p0 = pnand %p517_p13, %p511_p10 }
  0x41   :  { %378 = vmatpush3.bf16.msra.mxu0 %v425_v3  ;;  %398 = vmatpush3.bf16.msra.mxu1 %v434_v12 }
  0x42   :  { %379 = vmatprep.subr.bf16.mxu0 %v543_v0  ;;  %399 = vmatprep.subr.bf16.mxu1 %v543_v0 }
  0x45   :  { %380 = vmatpush3.bf16.msra.mxu0 %v426_v5  ;;  %400 = vmatpush3.bf16.msra.mxu1 %v435_v13 }
  0x46   :  { %381 = vmatprep.subr.bf16.mxu0 %v543_v0  ;;  %401 = vmatprep.subr.bf16.mxu1 %v543_v0 }
  0x49   :  { %382 = vmatpush3.bf16.msra.mxu0 %v427_v7  ;;  %402 = vmatpush3.bf16.msra.mxu1 %v436_v14 }
  0x4a   :  { %383 = vmatprep.subr.bf16.mxu0 %v543_v0  ;;  %403 = vmatprep.subr.bf16.mxu1 %v543_v0 }
  0x4d   :  { %384 = vmatpush3.bf16.msra.mxu0 %v428_v8  ;;  %404 = vmatpush3.bf16.msra.mxu1 %v437_v15 }
  0x4e   :  { %385 = vmatprep.subr.bf16.mxu0 %v543_v0  ;;  %405 = vmatprep.subr.bf16.mxu1 %v543_v0 }
  0x51   :  { %386 = vmatpush3.bf16.msra.mxu0 %v429_v9  ;;  %406 = vmatpush3.bf16.msra.mxu1 %v438_v16 }
  0x52   :  { %387 = vmatprep.subr.bf16.mxu0 %v543_v0  ;;  %407 = vmatprep.subr.bf16.mxu1 %v543_v0 }
  0x55   :  { %388 = vmatpush3.bf16.msra.mxu0 %v430_v10  ;;  %408 = vmatpush3.bf16.msra.mxu1 %v439_v17 }
  0x58   :  { %390 = vmatmul.mubr.bf16.vlgmr.msra.gmra.mrb[0].mxu0 %v431_v11 }
 0x12b   :  { %v189_v19 = vpop.f32.mrb[0].mxu0 }
 0x12c   :  { %v190_v20 = vadd.f32 %v337_v18, %v189_v19  ;;  %v391_v21 = vpop.f32.mrb[1].mxu0 }
 0x12d   :  { %v192_v22 = vpop.f32.mrb[2].mxu0 }
 0x12e   :  { %v198_v23 = vmul.f32 0.70710677, %v190_v20  ;;  %v193_v24 = vadd.f32 %v337_v18, %v192_v22  ;;  %v392_v25 = vpop.f32.mrb[3].mxu0  ;;  %v196_v30 = vmul.f32 0.5, %v190_v20 }
 0x130   :  { %440 = verf.f32 %v198_v23  ;;  %v199_v26 = vmul.f32 0.70710677, %v193_v24  ;;  %v197_v31 = vmul.f32 0.5, %v193_v24 }
 0x132   :  { %442 = verf.f32 %v199_v26 }
 0x13a   :  { %v441_v27 = vpop.eup %440 }
 0x13b   :  { %v202_v28 = vadd.f32 1.0, %v441_v27 }
 0x13c   :  { %v443_v29 = vpop.eup %442 }
 0x13d   :  { %v203_v32 = vadd.f32 1.0, %v443_v29  ;;  %v204_v33 = vmul.f32 %v202_v28, %v196_v30 }
 0x13f   :  { %v205_v34 = vmul.f32 %v203_v32, %v197_v31 }
 0x141   :  { %v208_v35 = vpack.c.bf16 %v205_v34, %v204_v33 }
 0x143   :  { %410 = vmatmul.mubr.bf16.vlgmr.msra.gmra.mrb[0].mxu1 %v208_v35 }
 0x216   :  { %v307_v37 = vpop.f32.mrb[0].mxu1 }
 0x217   :  { %v314_v38 = vadd.f32 %v336_v36, %v307_v37  ;;  %v411_v39 = vpop.f32.mrb[1].mxu1 }
 0x218   :  { %v310_v40 = vpop.f32.mrb[2].mxu1 }
 0x219   :  { %316 = vst [vmem:[#allocation8] sm:$0xff] %v314_v38  ;;  %v315_v41 = vadd.f32 %v336_v36, %v310_v40  ;;  %v412_v42 = vpop.f32.mrb[3].mxu1 }
 0x21b   :  { %317 = vst [vmem:[#allocation8 + $0x8] sm:$0xff] %v315_v41 }
 0x21c   :  { %521 = shalt.err (!%p518_p0)
}
 0x21d   :  { %s522_s10 = scalar_lea.hbm %s653_s5, 256 }
 0x21e   :  { %p523_p1 = scmp.ne.s32.totalorder %s653_s5, %s522_s10  ;;  %p526_p2 = scmp.lt.u32.totalorder %s522_s10, %s653_s5 }
 0x220   :  { %p528_p3 = pnand %p526_p2, %p523_p1 }
 0x222   :  { %531 = shalt.err (!%p528_p3)
}
 0x223   :  { %s546_s15 = smov 128   ;;  %s547_s16 = smov 8  }
 0x224   :  { %329 = dma.vmem_to_hbm [thread:$0]  %s324_s7, 256, %s653_s5, [#allocation4], %s546_s15, %s546_s15, %s547_s16  }
 0x225   :  { %536 = dma.done.wait [#allocation4], 256  }
 0x226   :  { %537 = vsyncadd [#allocation4], 4294967040 }
 0x227   :  { %333 = vsyncpa [#allocation3], 1 }
 0x228   :  { %334 = vsyncpa [#allocation6], 1 }
 0x229   :  { %335 = vsyncpa [#allocation4], 1 }

</bundles_post_ra>
